<compile_context>
chip_gen: v6e
topology: v6e:2x2x1
jax: 0.10.0
libtpu: 0.0.40
codegen_flags: <defaults>
</compile_context>

<pallas_src>
import jax
import jax.numpy as jnp
from jax.experimental import pallas as pl
from jax.experimental.pallas import tpu as pltpu


def mlp_kernel(x_ref, w1_ref, b1_ref, w2_ref, b2_ref, o_ref):
    # x_ref:  (1, tn)   batch tile, batch in lanes
    # w1_ref: (H, 1)    first-layer weight column
    # b1_ref: (H, 1)    first-layer bias column
    # w2_ref: (H, 1)    second-layer weight column
    # b2_ref: (1, 1)    second-layer bias
    # o_ref:  (1, tn)   output tile, batch in lanes
    x = x_ref[...]                                              # (1, tn)
    # Layer 1: outer-product broadcast on the VPU, then ReLU.
    h = jnp.maximum(w1_ref[...] * x + b1_ref[...], 0.0)        # (H, tn)
    # Layer 2: VPU multiply + XLU sublane reduction over H.
    y = jnp.sum(h * w2_ref[...], axis=0, keepdims=True) + b2_ref[...]  # (1, tn)
    o_ref[...] = y.astype(o_ref.dtype)


def net_forward(x, w1, b1, w2, b2, *, tn=None):
    """x: (N, 1) f32.  w1: (1, H), b1: (1, H), w2: (H, 1), b2: (1, 1)."""
    N, Din = x.shape
    H = w1.shape[1]
    Dout = w2.shape[1]
    assert Din == 1 and Dout == 1

    # Transposed, lane-dense layout (wrapper-side reshape is layout plumbing).
    x_t = x.T            # (1, N)   batch in lanes
    w1_c = w1.T          # (H, 1)
    b1_c = b1.T          # (H, 1)
    w2_c = w2            # (H, 1)
    b2_c = b2            # (1, 1)

    # One big grid step for small N; 2048-lane blocks for large N so HBM
    # streaming stays near roofline while amortizing per-step overhead.
    if tn is None:
        tn = N if N <= 2048 else 2048
    assert N % tn == 0, "batch must be a multiple of the batch tile"
    assert tn == N or tn % 128 == 0, "partial batch tiles must be lane-aligned"

    grid = (N // tn,)
    out_t = pl.pallas_call(
        mlp_kernel,
        out_shape=jax.ShapeDtypeStruct((1, N), x.dtype),
        grid_spec=pltpu.PrefetchScalarGridSpec(
            num_scalar_prefetch=0,
            grid=grid,
            in_specs=[
                pl.BlockSpec((1, tn), lambda i: (0, i)),     # x tile (lane-dense)
                pl.BlockSpec((H, 1), lambda i: (0, 0)),      # W1 column (whole)
                pl.BlockSpec((H, 1), lambda i: (0, 0)),      # b1 column (whole)
                pl.BlockSpec((H, 1), lambda i: (0, 0)),      # W2 column (whole)
                pl.BlockSpec((1, 1), lambda i: (0, 0)),      # b2 (whole)
            ],
            out_specs=pl.BlockSpec((1, tn), lambda i: (0, i)),
        ),
        compiler_params=pltpu.CompilerParams(
            dimension_semantics=("parallel",)),
        cost_estimate=pl.CostEstimate(
            flops=3 * N * H,            # ~ (mul+add+mul) per hidden element
            transcendentals=0,
            bytes_accessed=8 * N,       # 4 B in + 4 B out per batch element
        ),
    )(x_t, w1_c, b1_c, w2_c, b2_c)

    return out_t.T   # (N, 1) to match PyTorch output layout


def init_params(key):
    """Deterministic init mimicking PyTorch Linear default (U(-1/sqrt(fan_in), ...))."""
    k1, k2, k3, k4 = jax.random.split(key, 4)
    din, h, dout = 1, 20, 1
    bound1 = 1.0 / jnp.sqrt(din)
    bound2 = 1.0 / jnp.sqrt(h)
    w1 = jax.random.uniform(k1, (din, h), jnp.float32, -bound1, bound1)
    b1 = jax.random.uniform(k2, (1, h), jnp.float32, -bound1, bound1)
    w2 = jax.random.uniform(k3, (h, dout), jnp.float32, -bound2, bound2)
    b2 = jax.random.uniform(k4, (1, dout), jnp.float32, -bound2, bound2)
    return w1, b1, w2, b2


if __name__ == "__main__":
    key = jax.random.PRNGKey(0)
    w1, b1, w2, b2 = init_params(key)

    # Same flavor of input as the original script (linspace(-1, 1) unsqueezed),
    # at a small, lane-friendly batch size.
    N = 512
    x = jnp.linspace(-1.0, 1.0, N, dtype=jnp.float32)[:, None]  # (N, 1)

    out = net_forward(x, w1, b1, w2, b2)
    jax.block_until_ready(out)

    # Pure-JAX reference check.
    ref = jnp.maximum(x @ w1 + b1, 0.0) @ w2 + b2
    assert out.shape == (N, 1)
    assert jnp.allclose(out, ref, atol=1e-5, rtol=1e-5)

    print("KERNEL_OK")
</pallas_src>

<mosaic_0001>
module attributes {stable_mosaic.version = 11 : i64} {
  func.func @mlp_kernel(%arg0: i32, %arg1: memref<1x512xf32, #tpu.memory_space<vmem>>, %arg2: memref<20x1xf32, #tpu.memory_space<vmem>>, %arg3: memref<20x1xf32, #tpu.memory_space<vmem>>, %arg4: memref<20x1xf32, #tpu.memory_space<vmem>>, %arg5: memref<1x1xf32, #tpu.memory_space<vmem>>, %arg6: memref<1x512xf32, #tpu.memory_space<vmem>>) attributes {dimension_semantics = [#tpu.dimension_semantics<parallel>], iteration_bounds = array<i64: 1>, scalar_prefetch = 0 : i64, scratch_operands = 0 : i64, tpu.core_type = #tpu.core_type<tc>, window_params = [{transform_indices = @transform_0, window_bounds = array<i64: 1, 512>}, {pipeline_mode = #tpu.pipeline_mode<synchronous>, transform_indices = @transform_1, window_bounds = array<i64: 20, 1>}, {pipeline_mode = #tpu.pipeline_mode<synchronous>, transform_indices = @transform_2, window_bounds = array<i64: 20, 1>}, {pipeline_mode = #tpu.pipeline_mode<synchronous>, transform_indices = @transform_3, window_bounds = array<i64: 20, 1>}, {pipeline_mode = #tpu.pipeline_mode<synchronous>, transform_indices = @transform_4, window_bounds = array<i64: 1, 1>}, {transform_indices = @transform_5, window_bounds = array<i64: 1, 512>}]} {
    %c0 = arith.constant 0 : index
    %c0_0 = arith.constant 0 : index
    %0 = vector.load %arg1[%c0, %c0_0] : memref<1x512xf32, #tpu.memory_space<vmem>>, vector<1x512xf32>
    %c0_1 = arith.constant 0 : index
    %c0_2 = arith.constant 0 : index
    %1 = vector.load %arg2[%c0_1, %c0_2] : memref<20x1xf32, #tpu.memory_space<vmem>>, vector<20x1xf32>
    %2 = vector.broadcast %1 : vector<20x1xf32> to vector<20x512xf32>
    %3 = vector.broadcast %0 : vector<1x512xf32> to vector<20x512xf32>
    %4 = arith.mulf %2, %3 : vector<20x512xf32>
    %c0_3 = arith.constant 0 : index
    %c0_4 = arith.constant 0 : index
    %5 = vector.load %arg3[%c0_3, %c0_4] : memref<20x1xf32, #tpu.memory_space<vmem>>, vector<20x1xf32>
    %6 = vector.broadcast %5 : vector<20x1xf32> to vector<20x512xf32>
    %7 = arith.addf %4, %6 : vector<20x512xf32>
    %cst = arith.constant 0.000000e+00 : f32
    %8 = vector.broadcast %cst : f32 to vector<20x512xf32>
    %9 = arith.maximumf %7, %8 : vector<20x512xf32>
    %c0_5 = arith.constant 0 : index
    %c0_6 = arith.constant 0 : index
    %10 = vector.load %arg4[%c0_5, %c0_6] : memref<20x1xf32, #tpu.memory_space<vmem>>, vector<20x1xf32>
    %11 = vector.broadcast %10 : vector<20x1xf32> to vector<20x512xf32>
    %12 = arith.mulf %9, %11 : vector<20x512xf32>
    %cst_7 = arith.constant dense<0.000000e+00> : vector<512xf32>
    %13 = vector.multi_reduction <add>, %12, %cst_7 [0] : vector<20x512xf32> to vector<512xf32>
    %14 = vector.shape_cast %13 : vector<512xf32> to vector<1x512xf32>
    %c0_8 = arith.constant 0 : index
    %c0_9 = arith.constant 0 : index
    %15 = vector.load %arg5[%c0_8, %c0_9] : memref<1x1xf32, #tpu.memory_space<vmem>>, vector<1x1xf32>
    %16 = vector.broadcast %15 : vector<1x1xf32> to vector<1x512xf32>
    %17 = arith.addf %14, %16 : vector<1x512xf32>
    %c0_10 = arith.constant 0 : index
    %c0_11 = arith.constant 0 : index
    %18 = vector.load %arg6[%c0_10, %c0_11] : memref<1x512xf32, #tpu.memory_space<vmem>>, vector<1x512xf32>
    tpu.vector_store %arg6[%c0_10, %c0_11], %17 {strides = array<i32>} : memref<1x512xf32, #tpu.memory_space<vmem>>, vector<1x512xf32>,
    return
  }
  func.func @transform_0(%arg0: i32) -> (i32, i32) {
    %c0_i32 = arith.constant 0 : i32
    %c0_i32_0 = arith.constant 0 : i32
    return %c0_i32, %arg0 : i32, i32
  }
  func.func @transform_1(%arg0: i32) -> (i32, i32) {
    %c0_i32 = arith.constant 0 : i32
    %c0_i32_0 = arith.constant 0 : i32
    %c0_i32_1 = arith.constant 0 : i32
    return %c0_i32, %c0_i32_0 : i32, i32
  }
  func.func @transform_2(%arg0: i32) -> (i32, i32) {
    %c0_i32 = arith.constant 0 : i32
    %c0_i32_0 = arith.constant 0 : i32
    %c0_i32_1 = arith.constant 0 : i32
    return %c0_i32, %c0_i32_0 : i32, i32
  }
  func.func @transform_3(%arg0: i32) -> (i32, i32) {
    %c0_i32 = arith.constant 0 : i32
    %c0_i32_0 = arith.constant 0 : i32
    %c0_i32_1 = arith.constant 0 : i32
    return %c0_i32, %c0_i32_0 : i32, i32
  }
  func.func @transform_4(%arg0: i32) -> (i32, i32) {
    %c0_i32 = arith.constant 0 : i32
    %c0_i32_0 = arith.constant 0 : i32
    %c0_i32_1 = arith.constant 0 : i32
    return %c0_i32, %c0_i32_0 : i32, i32
  }
  func.func @transform_5(%arg0: i32) -> (i32, i32) {
    %c0_i32 = arith.constant 0 : i32
    %c0_i32_0 = arith.constant 0 : i32
    return %c0_i32, %arg0 : i32, i32
  }
}

</mosaic_0001>

<bundles_post_ra>
// kernel: tpu_custom_call.1
= control target key start
LH: loop header
LB: loop body
LE: loop exit
PB: predicated region body
PF: predicated region fallthrough
CT: control target
= control target key end

     0   :  { %s355_s0 = inlined_call_operand.vmem [shape: f32[1,512], index: 0, kind: input, shape index: {}]   ;;  %s356_s1 = inlined_call_operand.vmem [shape: f32[20,1], index: 1, kind: input, shape index: {}]   ;;  %s357_s2 = inlined_call_operand.vmem [shape: f32[20,1], index: 2, kind: input, shape index: {}]   ;;  %s358_s3 = inlined_call_operand.vmem [shape: f32[20,1], index: 3, kind: input, shape index: {}]   ;;  %s359_s4 = inlined_call_operand.<no memory space> [shape: f32[1,1], index: 4, kind: input, shape index: {}]   ;;  %s360_s5 = inlined_call_operand.hbm [shape: f32[1,512], index: 5, kind: output, shape index: {}]  }
   0x1   :  { %v10_v0 = vstv %s359_s4 }
   0x2   :  { %11 = vst [vmem:[#allocation2] sm:$0x1] %v10_v0 }
   0x3   :  { %v26_v1 = vld [vmem:[%s356_s1 + $0x10] sm:$0xf]  ;;  %v24_v2 = vld [vmem:[%s356_s1] sm:$0xff]  ;;  %v273_v3 = vmov 0   ;;  %v25_v5 = vld [vmem:[%s356_s1 + $0x8] sm:$0xff] }
   0x4   :  { %250 = vset.pattern.permute.xlu1 %v273_v3  ;;  %249 = vset.pattern.permute.xlu0 %v273_v3  ;;  %v75_v4 = vld [vmem:[%s357_s2] sm:$0xff] }
   0x5   :  { %39 = vperm.xlu1 %250, %v26_v1   ;;  %29 = vperm.xlu0 %249, %v24_v2  }
   0x6   :  { %12 = vsyncpa [#allocation4], 0  ;;  %v77_v6 = vld [vmem:[%s357_s2 + $0x10] sm:$0xf]  ;;  %v76_v7 = vld [vmem:[%s357_s2 + $0x8] sm:$0xff]  ;;  %v43_v12 = vlaneseq  ;;  %vm148_vm0 = vcmask 1043456  }
   0x7   :  { %v118_v8 = vld [vmem:[%s358_s3 + $0x8] sm:$0xff]  ;;  %v117_v9 = vld [vmem:[%s358_s3] sm:$0xff]  ;;  %v119_v11 = vld [vmem:[%s358_s3 + $0x10] sm:$0xf] }
   0x8   :  { %v337_v13 = vshrl.u32 %v43_v12, 7  ;;  %v23_v15 = vld [vmem:[%s355_s0] sm:$0xf]  ;;  %s275_s0 = smov [#allocation3]   ;;  %vm229_vm1 = vcmp.lt.s32.totalorder %v43_v12, 512 }
   0x9   :  { %80 = vperm.xlu1 %250, %v75_v4   ;;  %34 = vperm.xlu0 %249, %v25_v5   ;;  %v184_v10 = vld [vmem:[#allocation2] sm:$0x1]  ;;  %s238_s3 = sshll.u32 %s275_s0, 4  ;;  %s239_s3 = int_to_ptr.vmem [resolvable:$true] %s238_s3 }
   0xa   :  { %v45_v14 = vsub.s32 0, %v337_v13  ;;  %v49_v16 = vsub.s32 1, %v337_v13  ;;  %v53_v17 = vsub.s32 2, %v337_v13  ;;  %v57_v19 = vsub.s32 3, %v337_v13  ;;  %s251_s12 = scalar_lea.vmem %s239_s3, 64  ;;  %p256_p1 = scmp.lt.s32.totalorder %s239_s3, %s239_s3 }
   0xb   :  { %p252_p0 = scmp.ne.s32.totalorder %s239_s3, %s251_s12  ;;  %p257_p2 = scmp.lt.s32.totalorder %s251_s12, %s251_s12 }
   0xc   :  { %v46_v18 = vrot.slane %v23_v15, %v45_v14  ;;  %v50_v22 = vrot.slane %v23_v15, %v49_v16  ;;  %v54_v23 = vrot.slane %v23_v15, %v53_v17  ;;  %v58_v25 = vrot.slane %v23_v15, %v57_v19 }
   0xd   :  { %90 = vperm.xlu1 %250, %v77_v6   ;;  %85 = vperm.xlu0 %249, %v76_v7   ;;  %p258_p3 = por %p257_p2, %p256_p1 }
   0xf   :  { %p259_p4 = pnand %p258_p3, %p252_p0 }
  0x11   :  { %127 = vperm.xlu1 %250, %v118_v8   ;;  %122 = vperm.xlu0 %249, %v117_v9  }
  0x15   :  { %187 = vperm.xlu1 %250, %v184_v10   ;;  %132 = vperm.xlu0 %249, %v119_v11  }
  0x80   :  { %v40_v20 = vpop.permute.xlu1 %39  ;;  %v30_v21 = vpop.permute.xlu0 %29 }
  0x81   :  { %v63_v24 = vmul.f32 %v46_v18, %v30_v21  ;;  %v64_v28 = vmul.f32 %v50_v22, %v30_v21  ;;  %v65_v30 = vmul.f32 %v54_v23, %v30_v21  ;;  %v71_v31 = vmul.f32 %v46_v18, %v40_v20 }
  0x82   :  { %v72_v32 = vmul.f32 %v50_v22, %v40_v20  ;;  %v73_v35 = vmul.f32 %v54_v23, %v40_v20  ;;  %v66_v36 = vmul.f32 %v58_v25, %v30_v21  ;;  %v74_v40 = vmul.f32 %v58_v25, %v40_v20 }
  0x84   :  { %v81_v26 = vpop.permute.xlu1 %80  ;;  %v35_v27 = vpop.permute.xlu0 %34 }
  0x85   :  { %v93_v29 = vadd.f32 %v81_v26, %v63_v24  ;;  %v94_v33 = vadd.f32 %v81_v26, %v64_v28  ;;  %v67_v34 = vmul.f32 %v46_v18, %v35_v27  ;;  %v95_v37 = vadd.f32 %v81_v26, %v65_v30 }
  0x86   :  { %v68_v41 = vmul.f32 %v50_v22, %v35_v27  ;;  %v69_v42 = vmul.f32 %v54_v23, %v35_v27  ;;  %v70_v43 = vmul.f32 %v58_v25, %v35_v27  ;;  %v96_v47 = vadd.f32 %v81_v26, %v66_v36 }
  0x87   :  { %v105_v45 = vmax.f32 %v93_v29, 0.0  ;;  %v106_v51 = vmax.f32 %v94_v33, 0.0  ;;  %v107_v55 = vmax.f32 %v95_v37, 0.0 }
  0x88   :  { %v91_v38 = vpop.permute.xlu1 %90  ;;  %v86_v39 = vpop.permute.xlu0 %85  ;;  %v108_v1 = vmax.f32 %v96_v47, 0.0 }
  0x89   :  { %v97_v44 = vadd.f32 %v86_v39, %v67_v34  ;;  %v101_v46 = vadd.f32 %v91_v38, %v71_v31  ;;  %v98_v48 = vadd.f32 %v86_v39, %v68_v41  ;;  %v99_v49 = vadd.f32 %v86_v39, %v69_v42 }
  0x8a   :  { %v100_v50 = vadd.f32 %v86_v39, %v70_v43  ;;  %v102_v53 = vadd.f32 %v91_v38, %v72_v32  ;;  %v103_v54 = vadd.f32 %v91_v38, %v73_v35  ;;  %v104_v58 = vadd.f32 %v91_v38, %v74_v40 }
  0x8b   :  { %v109_v52 = vmax.f32 %v97_v44, 0.0  ;;  %v110_v59 = vmax.f32 %v98_v48, 0.0  ;;  %v111_v60 = vmax.f32 %v99_v49, 0.0  ;;  %v113_v0 = vmax.f32 %v101_v46, 0.0 }
  0x8c   :  { %v128_v56 = vpop.permute.xlu1 %127  ;;  %v123_v57 = vpop.permute.xlu0 %122  ;;  %v112_v61 = vmax.f32 %v100_v50, 0.0  ;;  %v114_v6 = vmax.f32 %v102_v53, 0.0  ;;  %v115_v7 = vmax.f32 %v103_v54, 0.0  ;;  %v116_v11 = vmax.f32 %v104_v58, 0.0 }
  0x8d   :  { %v135_v62 = vmul.f32 %v123_v57, %v105_v45  ;;  %v139_v63 = vmul.f32 %v128_v56, %v109_v52  ;;  %v136_v2 = vmul.f32 %v123_v57, %v106_v51  ;;  %v137_v3 = vmul.f32 %v123_v57, %v107_v55 }
  0x8e   :  { %v140_v4 = vmul.f32 %v128_v56, %v110_v59  ;;  %v141_v5 = vmul.f32 %v128_v56, %v111_v60  ;;  %v138_v8 = vmul.f32 %v123_v57, %v108_v1  ;;  %v142_v9 = vmul.f32 %v128_v56, %v112_v61 }
  0x8f   :  { %v147_v19 = vadd.f32 %v139_v63, %v135_v62  ;;  %v274_v42 = vmov 1966171168  }
  0x90   :  { %v133_v10 = vpop.permute.xlu0 %132  ;;  %v157_v20 = vadd.f32 %v140_v4, %v136_v2  ;;  %v166_v21 = vadd.f32 %v141_v5, %v137_v3  ;;  %v175_v25 = vadd.f32 %v142_v9, %v138_v8  ;;  %v205_v43 = vunpack.c.l.s4 %v274_v42  ;;  %v188_v48 = vpop.permute.xlu1 %187 }
  0x91   :  { %v143_v15 = vmul.f32 %v133_v10, %v113_v0  ;;  %v144_v16 = vmul.f32 %v133_v10, %v114_v6  ;;  %v145_v17 = vmul.f32 %v133_v10, %v115_v7  ;;  %v146_v18 = vmul.f32 %v133_v10, %v116_v11 }
  0x92   :  { %v206_v53 = vunpack.c.0.s8 %v205_v43  ;;  %v193_v55 = vrot.slane %v188_v48, %v45_v14 }
  0x93   :  { %v149_v22 = vsel %vm148_vm0, %v143_v15, 0.0  ;;  %v158_v23 = vsel %vm148_vm0, %v144_v16, 0.0  ;;  %v167_v24 = vsel %vm148_vm0, %v145_v17, 0.0  ;;  %v176_v27 = vsel %vm148_vm0, %v146_v18, 0.0 }
  0x94   :  { %v150_v26 = vadd.f32 %v149_v22, %v147_v19  ;;  %v159_v28 = vadd.f32 %v158_v23, %v157_v20  ;;  %v168_v29 = vadd.f32 %v167_v24, %v166_v21  ;;  %v177_v30 = vadd.f32 %v176_v27, %v175_v25 }
  0x95   :  { %v209_v63 = vsub.s32 %v206_v53, %v337_v13 }
  0x96   :  { %v151_v31 = vrot.slane %v150_v26, 4  ;;  %v160_v32 = vrot.slane %v159_v28, 4  ;;  %v169_v33 = vrot.slane %v168_v29, 4  ;;  %v178_v34 = vrot.slane %v177_v30, 4 }
  0x98   :  { %v152_v35 = vadd.f32 %v151_v31, %v150_v26  ;;  %v161_v36 = vadd.f32 %v160_v32, %v159_v28  ;;  %v170_v37 = vadd.f32 %v169_v33, %v168_v29  ;;  %v179_v38 = vadd.f32 %v178_v34, %v177_v30 }
  0x9a   :  { %v153_v39 = vrot.slane %v152_v35, 2  ;;  %v162_v40 = vrot.slane %v161_v36, 2  ;;  %v171_v41 = vrot.slane %v170_v37, 2  ;;  %v180_v44 = vrot.slane %v179_v38, 2 }
  0x9c   :  { %v154_v45 = vadd.f32 %v153_v39, %v152_v35  ;;  %v163_v46 = vadd.f32 %v162_v40, %v161_v36  ;;  %v172_v47 = vadd.f32 %v171_v41, %v170_v37  ;;  %v181_v49 = vadd.f32 %v180_v44, %v179_v38 }
  0x9e   :  { %v155_v50 = vrot.slane %v154_v45, 1  ;;  %v164_v51 = vrot.slane %v163_v46, 1  ;;  %v173_v52 = vrot.slane %v172_v47, 1  ;;  %v182_v54 = vrot.slane %v181_v49, 1 }
  0xa0   :  { %v156_v56 = vadd.f32 %v155_v50, %v154_v45  ;;  %v165_v57 = vadd.f32 %v164_v51, %v163_v46  ;;  %v174_v58 = vadd.f32 %v173_v52, %v172_v47  ;;  %v183_v59 = vadd.f32 %v182_v54, %v181_v49 }
  0xa2   :  { %v194_v60 = vadd.f32 %v193_v55, %v156_v56  ;;  %v195_v61 = vadd.f32 %v193_v55, %v165_v57  ;;  %v196_v62 = vadd.f32 %v193_v55, %v174_v58  ;;  %v197_v0 = vadd.f32 %v193_v55, %v183_v59 }
  0xa4   :  { %v202_v1 = vcombine.low %v194_v60, %v195_v61  ;;  %v203_v2 = vcombine.low %v196_v62, %v197_v0 }
  0xa6   :  { %v210_v3 = vrot.slane %v202_v1, %v209_v63  ;;  %v217_v4 = vrot.slane %v203_v2, %v209_v63 }
  0xa8   :  { %v218_v5 = vcombine.low %v210_v3, %v217_v4 }
  0xaa   :  { %v225_v14 = vrot.slane %v218_v5, %v209_v63 }
  0xac   :  { %231 = vst.msk [vmem:[#allocation3] sm:$0xf] %vm229_vm1, %v225_v14 }
  0xad   :  { %262 = shalt.err (!%p259_p4)
}
  0xae   :  { %241 = dma.vmem_to_hbm [thread:$0]  %s239_s3, 64, %s360_s5, [#allocation4]  }
  0xaf   :  { %271 = dma.done.wait [#allocation4], 64  }
  0xb0   :  { %272 = vsyncadd [#allocation4], 4294967232 }
  0xb1   :  { %245 = vsyncpa [#allocation4], 1 }

</bundles_post_ra>
